<compile_context>
chip_gen: v5e
topology: v5e:2x2
jax: 0.10.0
libtpu: 0.0.40
codegen_flags: <defaults>
</compile_context>

<pallas_src>
import math

import jax
import jax.numpy as jnp
from jax.experimental import pallas as pl
from jax.experimental.pallas import tpu as pltpu


def _round_up(x, m):
    return ((x + m - 1) // m) * m


# ---------------------------------------------------------------------------
# Pallas kernel: both Q heads in one shot, fused weight slabs.
# ---------------------------------------------------------------------------
def _double_q_kernel(x_ref, w1_ref, b1_ref, w2_ref, b2_ref, w3_ref, b3_ref, out_ref):
    H = w2_ref.shape[1]
    TB = out_ref.shape[0]

    # ---- layer 1: one wide bf16 MXU dot for both heads -> (TB, 2H) fp32 ----
    h = jnp.dot(x_ref[...], w1_ref[...], preferred_element_type=jnp.float32)
    h = jnp.maximum(h + b1_ref[...], 0.0)
    h_bf = h.astype(jnp.bfloat16)

    # ---- layer 2: per-head bf16 dot, fp32 accumulate, ReLU ----
    # (two (TB,H)x(H,H) dots = half the MXU passes of one block-diagonal
    #  (TB,2H)x(2H,2H) dot, so keep them separate)
    h1 = jnp.dot(h_bf[:, :H], w2_ref[0], preferred_element_type=jnp.float32)
    h1 = jnp.maximum(h1 + b2_ref[0], 0.0)
    h2 = jnp.dot(h_bf[:, H:], w2_ref[1], preferred_element_type=jnp.float32)
    h2 = jnp.maximum(h2 + b2_ref[1], 0.0)

    # ---- layer 3: N=1 projection on VPU + lane reduction (keeps MXU free) ----
    q1 = jnp.sum(h1 * w3_ref[0], axis=-1, keepdims=True)   # (TB, 1) fp32
    q2 = jnp.sum(h2 * w3_ref[1], axis=-1, keepdims=True)   # (TB, 1) fp32

    # pack both heads into a single (TB, 2) store (one output DMA, no concat)
    lane = jax.lax.broadcasted_iota(jnp.int32, (TB, 2), 1)
    q = jnp.where(lane == 0, q1, q2)                        # (TB, 2)
    out_ref[...] = q + b3_ref[...]


# ---------------------------------------------------------------------------
# Parameter construction (mimics torch.nn.Linear default init:
# U(-1/sqrt(fan_in), 1/sqrt(fan_in)) for weight and bias), then packed into
# the fused slabs the kernel expects.
# ---------------------------------------------------------------------------
def init_double_q_params(key, state_dim, action_dim, hidden_size=256):
    in_dim = state_dim + action_dim
    Kp = _round_up(in_dim, 128)          # pad K to MXU lane width
    H = hidden_size
    keys = jax.random.split(key, 6)

    def linear(k, fan_in, fan_out):
        kw, kb = jax.random.split(k)
        bound = 1.0 / math.sqrt(fan_in)
        w = jax.random.uniform(kw, (fan_in, fan_out), jnp.float32, -bound, bound)
        b = jax.random.uniform(kb, (fan_out,), jnp.float32, -bound, bound)
        return w, b

    w1_1, b1_1 = linear(keys[0], in_dim, H)
    w2_1, b2_1 = linear(keys[1], H, H)
    w3_1, b3_1 = linear(keys[2], H, 1)
    w1_2, b1_2 = linear(keys[3], in_dim, H)
    w2_2, b2_2 = linear(keys[4], H, H)
    w3_2, b3_2 = linear(keys[5], H, 1)

    # fused slabs -------------------------------------------------------------
    w1_slab = jnp.zeros((Kp, 2 * H), jnp.float32)
    w1_slab = w1_slab.at[:in_dim, :H].set(w1_1)
    w1_slab = w1_slab.at[:in_dim, H:].set(w1_2)
    w1_slab = w1_slab.astype(jnp.bfloat16)                   # (Kp, 2H) bf16

    b1_slab = jnp.concatenate([b1_1, b1_2])[None, :]          # (1, 2H) f32
    w2_slab = jnp.stack([w2_1, w2_2]).astype(jnp.bfloat16)    # (2, H, H) bf16
    b2_slab = jnp.stack([b2_1, b2_2])                         # (2, H) f32
    w3_slab = jnp.stack([w3_1[:, 0], w3_2[:, 0]])             # (2, H) f32 (VPU path)
    b3_slab = jnp.concatenate([b3_1, b3_2])[None, :]          # (1, 2) f32
    return (w1_slab, b1_slab, w2_slab, b2_slab, w3_slab, b3_slab)


# ---------------------------------------------------------------------------
# Wrapper: concat + pad in plain JAX (cheap), batch-parallel grid, resident
# weights, single lane-packed output.
# ---------------------------------------------------------------------------
def double_q_forward(state, action, params):
    w1, b1, w2, b2, w3, b3 = params
    B = state.shape[0]
    Kp = w1.shape[0]
    H = w2.shape[1]

    x = jnp.concatenate([state, action], axis=1).astype(jnp.float32)
    in_dim = x.shape[1]

    # batch tile: multiple of 8 sublanes, capped so activations stay well
    # within v7x's smaller VMEM even with double buffering.
    TB = min(_round_up(B, 8), 512)
    B_pad = _round_up(B, TB)
    x = jnp.pad(x, ((0, B_pad - B), (0, Kp - in_dim))).astype(jnp.bfloat16)

    grid = (B_pad // TB,)

    out = pl.pallas_call(
        _double_q_kernel,
        out_shape=jax.ShapeDtypeStruct((B_pad, 2), jnp.float32),
        grid_spec=pltpu.PrefetchScalarGridSpec(
            num_scalar_prefetch=0,
            grid=grid,
            in_specs=[
                pl.BlockSpec((TB, Kp), lambda i: (i, 0)),        # x (batch-tiled)
                pl.BlockSpec((Kp, 2 * H), lambda i: (0, 0)),     # w1 slab (resident)
                pl.BlockSpec((1, 2 * H), lambda i: (0, 0)),      # b1 slab
                pl.BlockSpec((2, H, H), lambda i: (0, 0, 0)),    # w2 slab
                pl.BlockSpec((2, H), lambda i: (0, 0)),          # b2 slab
                pl.BlockSpec((2, H), lambda i: (0, 0)),          # w3 slab
                pl.BlockSpec((1, 2), lambda i: (0, 0)),          # b3 slab
            ],
            out_specs=pl.BlockSpec((TB, 2), lambda i: (i, 0)),
        ),
        compiler_params=pltpu.CompilerParams(
            dimension_semantics=("parallel",),
        ),
    )(x, w1, b1, w2, b2, w3, b3)

    out = out[:B]
    return out[:, 0:1], out[:, 1:2]


# Pure-JAX reference mirroring the kernel's math (same bf16 casts, fp32 accum).
def _reference_forward(state, action, params):
    w1, b1, w2, b2, w3, b3 = params
    Kp = w1.shape[0]
    H = w2.shape[1]
    x = jnp.concatenate([state, action], axis=1).astype(jnp.float32)
    x = jnp.pad(x, ((0, 0), (0, Kp - x.shape[1]))).astype(jnp.bfloat16)

    h = jnp.maximum(
        jnp.dot(x, w1, preferred_element_type=jnp.float32) + b1, 0.0)
    h_bf = h.astype(jnp.bfloat16)
    h1 = jnp.maximum(
        jnp.dot(h_bf[:, :H], w2[0], preferred_element_type=jnp.float32) + b2[0], 0.0)
    h2 = jnp.maximum(
        jnp.dot(h_bf[:, H:], w2[1], preferred_element_type=jnp.float32) + b2[1], 0.0)
    q1 = jnp.sum(h1 * w3[0], axis=-1, keepdims=True) + b3[:, 0:1]
    q2 = jnp.sum(h2 * w3[1], axis=-1, keepdims=True) + b3[:, 1:2]
    return q1, q2


if __name__ == "__main__":
    key = jax.random.PRNGKey(0)
    k_params, k_state, k_action = jax.random.split(key, 3)

    # small shapes consistent with the module: hidden_size=256 is the module
    # default (and MXU-aligned); batch kept small.
    batch = 16
    state_dim = 17
    action_dim = 6
    hidden_size = 256

    params = init_double_q_params(k_params, state_dim, action_dim, hidden_size)

    state = jax.random.normal(k_state, (batch, state_dim), jnp.float32)
    action = jax.random.normal(k_action, (batch, action_dim), jnp.float32)

    q1, q2 = double_q_forward(state, action, params)
    jax.block_until_ready((q1, q2))

    q1_ref, q2_ref = _reference_forward(state, action, params)
    assert q1.shape == (batch, 1) and q2.shape == (batch, 1)
    assert jnp.allclose(q1, q1_ref, atol=1e-3, rtol=1e-3)
    assert jnp.allclose(q2, q2_ref, atol=1e-3, rtol=1e-3)

    print("KERNEL_OK")
</pallas_src>

<mosaic_0001>
module attributes {stable_mosaic.version = 11 : i64} {
  func.func @_double_q_kernel(%arg0: i32, %arg1: memref<16x128xbf16, #tpu.memory_space<vmem>>, %arg2: memref<128x512xbf16, #tpu.memory_space<vmem>>, %arg3: memref<1x512xf32, #tpu.memory_space<vmem>>, %arg4: memref<2x256x256xbf16, #tpu.memory_space<vmem>>, %arg5: memref<2x256xf32, #tpu.memory_space<vmem>>, %arg6: memref<2x256xf32, #tpu.memory_space<vmem>>, %arg7: memref<1x2xf32, #tpu.memory_space<vmem>>, %arg8: memref<16x2xf32, #tpu.memory_space<vmem>>) attributes {dimension_semantics = [#tpu.dimension_semantics<parallel>], iteration_bounds = array<i64: 1>, scalar_prefetch = 0 : i64, scratch_operands = 0 : i64, tpu.core_type = #tpu.core_type<tc>, window_params = [{transform_indices = @transform_0, window_bounds = array<i64: 16, 128>}, {pipeline_mode = #tpu.pipeline_mode<synchronous>, transform_indices = @transform_1, window_bounds = array<i64: 128, 512>}, {pipeline_mode = #tpu.pipeline_mode<synchronous>, transform_indices = @transform_2, window_bounds = array<i64: 1, 512>}, {pipeline_mode = #tpu.pipeline_mode<synchronous>, transform_indices = @transform_3, window_bounds = array<i64: 2, 256, 256>}, {pipeline_mode = #tpu.pipeline_mode<synchronous>, transform_indices = @transform_4, window_bounds = array<i64: 2, 256>}, {pipeline_mode = #tpu.pipeline_mode<synchronous>, transform_indices = @transform_5, window_bounds = array<i64: 2, 256>}, {pipeline_mode = #tpu.pipeline_mode<synchronous>, transform_indices = @transform_6, window_bounds = array<i64: 1, 2>}, {transform_indices = @transform_7, window_bounds = array<i64: 16, 2>}]} {
    %c0 = arith.constant 0 : index
    %c0_0 = arith.constant 0 : index
    %0 = vector.load %arg1[%c0, %c0_0] : memref<16x128xbf16, #tpu.memory_space<vmem>>, vector<16x128xbf16>
    %c0_1 = arith.constant 0 : index
    %c0_2 = arith.constant 0 : index
    %1 = vector.load %arg2[%c0_1, %c0_2] : memref<128x512xbf16, #tpu.memory_space<vmem>>, vector<128x512xbf16>
    %cst = arith.constant dense<0.000000e+00> : vector<16x512xf32>
    %2 = tpu.matmul %0, %1, %cst {dimension_numbers = #tpu.dot_dimension_numbers<[1], [0], [0], [1], [0, 0, 1, 1], [], []>} : vector<16x128xbf16>, vector<128x512xbf16>, vector<16x512xf32> -> vector<16x512xf32>
    %c0_3 = arith.constant 0 : index
    %c0_4 = arith.constant 0 : index
    %3 = vector.load %arg3[%c0_3, %c0_4] : memref<1x512xf32, #tpu.memory_space<vmem>>, vector<1x512xf32>
    %4 = vector.broadcast %3 : vector<1x512xf32> to vector<16x512xf32>
    %5 = arith.addf %2, %4 : vector<16x512xf32>
    %cst_5 = arith.constant 0.000000e+00 : f32
    %6 = vector.broadcast %cst_5 : f32 to vector<16x512xf32>
    %7 = arith.maximumf %5, %6 : vector<16x512xf32>
    %8 = arith.truncf %7 : vector<16x512xf32> to vector<16x512xbf16>
    %9 = vector.extract_strided_slice %8 {offsets = [0, 0], sizes = [16, 256], strides = [1, 1]} : vector<16x512xbf16> to vector<16x256xbf16>
    %c0_6 = arith.constant 0 : index
    %c0_7 = arith.constant 0 : index
    %c0_8 = arith.constant 0 : index
    %10 = vector.load %arg4[%c0_6, %c0_7, %c0_8] : memref<2x256x256xbf16, #tpu.memory_space<vmem>>, vector<1x256x256xbf16>
    %11 = vector.shape_cast %10 : vector<1x256x256xbf16> to vector<256x256xbf16>
    %cst_9 = arith.constant dense<0.000000e+00> : vector<16x256xf32>
    %12 = tpu.matmul %9, %11, %cst_9 {dimension_numbers = #tpu.dot_dimension_numbers<[1], [0], [0], [1], [0, 0, 1, 1], [], []>} : vector<16x256xbf16>, vector<256x256xbf16>, vector<16x256xf32> -> vector<16x256xf32>
    %c0_10 = arith.constant 0 : index
    %c0_11 = arith.constant 0 : index
    %13 = vector.load %arg5[%c0_10, %c0_11] : memref<2x256xf32, #tpu.memory_space<vmem>>, vector<1x256xf32>
    %14 = vector.shape_cast %13 : vector<1x256xf32> to vector<256xf32>
    %15 = vector.shape_cast %14 : vector<256xf32> to vector<1x256xf32>
    %16 = vector.broadcast %15 : vector<1x256xf32> to vector<16x256xf32>
    %17 = arith.addf %12, %16 : vector<16x256xf32>
    %cst_12 = arith.constant 0.000000e+00 : f32
    %18 = vector.broadcast %cst_12 : f32 to vector<16x256xf32>
    %19 = arith.maximumf %17, %18 : vector<16x256xf32>
    %20 = vector.extract_strided_slice %8 {offsets = [0, 256], sizes = [16, 256], strides = [1, 1]} : vector<16x512xbf16> to vector<16x256xbf16>
    %c1 = arith.constant 1 : index
    %c0_13 = arith.constant 0 : index
    %c0_14 = arith.constant 0 : index
    %21 = vector.load %arg4[%c1, %c0_13, %c0_14] : memref<2x256x256xbf16, #tpu.memory_space<vmem>>, vector<1x256x256xbf16>
    %22 = vector.shape_cast %21 : vector<1x256x256xbf16> to vector<256x256xbf16>
    %cst_15 = arith.constant dense<0.000000e+00> : vector<16x256xf32>
    %23 = tpu.matmul %20, %22, %cst_15 {dimension_numbers = #tpu.dot_dimension_numbers<[1], [0], [0], [1], [0, 0, 1, 1], [], []>} : vector<16x256xbf16>, vector<256x256xbf16>, vector<16x256xf32> -> vector<16x256xf32>
    %c1_16 = arith.constant 1 : index
    %c0_17 = arith.constant 0 : index
    %24 = vector.load %arg5[%c1_16, %c0_17] : memref<2x256xf32, #tpu.memory_space<vmem>>, vector<1x256xf32>
    %25 = vector.shape_cast %24 : vector<1x256xf32> to vector<256xf32>
    %26 = vector.shape_cast %25 : vector<256xf32> to vector<1x256xf32>
    %27 = vector.broadcast %26 : vector<1x256xf32> to vector<16x256xf32>
    %28 = arith.addf %23, %27 : vector<16x256xf32>
    %cst_18 = arith.constant 0.000000e+00 : f32
    %29 = vector.broadcast %cst_18 : f32 to vector<16x256xf32>
    %30 = arith.maximumf %28, %29 : vector<16x256xf32>
    %c0_19 = arith.constant 0 : index
    %c0_20 = arith.constant 0 : index
    %31 = vector.load %arg6[%c0_19, %c0_20] : memref<2x256xf32, #tpu.memory_space<vmem>>, vector<1x256xf32>
    %32 = vector.shape_cast %31 : vector<1x256xf32> to vector<256xf32>
    %33 = vector.shape_cast %32 : vector<256xf32> to vector<1x256xf32>
    %34 = vector.broadcast %33 : vector<1x256xf32> to vector<16x256xf32>
    %35 = arith.mulf %19, %34 : vector<16x256xf32>
    %cst_21 = arith.constant dense<0.000000e+00> : vector<16xf32>
    %36 = vector.multi_reduction <add>, %35, %cst_21 [1] : vector<16x256xf32> to vector<16xf32>
    %37 = vector.shape_cast %36 : vector<16xf32> to vector<16x1xf32>
    %c1_22 = arith.constant 1 : index
    %c0_23 = arith.constant 0 : index
    %38 = vector.load %arg6[%c1_22, %c0_23] : memref<2x256xf32, #tpu.memory_space<vmem>>, vector<1x256xf32>
    %39 = vector.shape_cast %38 : vector<1x256xf32> to vector<256xf32>
    %40 = vector.shape_cast %39 : vector<256xf32> to vector<1x256xf32>
    %41 = vector.broadcast %40 : vector<1x256xf32> to vector<16x256xf32>
    %42 = arith.mulf %30, %41 : vector<16x256xf32>
    %cst_24 = arith.constant dense<0.000000e+00> : vector<16xf32>
    %43 = vector.multi_reduction <add>, %42, %cst_24 [1] : vector<16x256xf32> to vector<16xf32>
    %44 = vector.shape_cast %43 : vector<16xf32> to vector<16x1xf32>
    %45 = tpu.iota {dimensions = array<i32: 1>} : vector<16x2xi32>
    %c0_i32 = arith.constant 0 : i32
    %46 = vector.broadcast %c0_i32 : i32 to vector<16x2xi32>
    %47 = arith.cmpi eq, %45, %46 : vector<16x2xi32>
    %48 = vector.shape_cast %37 : vector<16x1xf32> to vector<16x1xf32>
    %49 = vector.broadcast %48 : vector<16x1xf32> to vector<16x2xf32>
    %50 = vector.shape_cast %44 : vector<16x1xf32> to vector<16x1xf32>
    %51 = vector.broadcast %50 : vector<16x1xf32> to vector<16x2xf32>
    %52 = arith.select %47, %49, %51 : vector<16x2xi1>, vector<16x2xf32>
    %c0_25 = arith.constant 0 : index
    %c0_26 = arith.constant 0 : index
    %53 = vector.load %arg7[%c0_25, %c0_26] : memref<1x2xf32, #tpu.memory_space<vmem>>, vector<1x2xf32>
    %54 = vector.broadcast %53 : vector<1x2xf32> to vector<16x2xf32>
    %55 = arith.addf %52, %54 : vector<16x2xf32>
    %c0_27 = arith.constant 0 : index
    %c0_28 = arith.constant 0 : index
    %56 = vector.load %arg8[%c0_27, %c0_28] : memref<16x2xf32, #tpu.memory_space<vmem>>, vector<16x2xf32>
    tpu.vector_store %arg8[%c0_27, %c0_28], %55 {strides = array<i32>} : memref<16x2xf32, #tpu.memory_space<vmem>>, vector<16x2xf32>,
    return
  }
  func.func @transform_0(%arg0: i32) -> (i32, i32) {
    %c0_i32 = arith.constant 0 : i32
    %c0_i32_0 = arith.constant 0 : i32
    return %arg0, %c0_i32 : i32, i32
  }
  func.func @transform_1(%arg0: i32) -> (i32, i32) {
    %c0_i32 = arith.constant 0 : i32
    %c0_i32_0 = arith.constant 0 : i32
    %c0_i32_1 = arith.constant 0 : i32
    return %c0_i32, %c0_i32_0 : i32, i32
  }
  func.func @transform_2(%arg0: i32) -> (i32, i32) {
    %c0_i32 = arith.constant 0 : i32
    %c0_i32_0 = arith.constant 0 : i32
    %c0_i32_1 = arith.constant 0 : i32
    return %c0_i32, %c0_i32_0 : i32, i32
  }
  func.func @transform_3(%arg0: i32) -> (i32, i32, i32) {
    %c0_i32 = arith.constant 0 : i32
    %c0_i32_0 = arith.constant 0 : i32
    %c0_i32_1 = arith.constant 0 : i32
    %c0_i32_2 = arith.constant 0 : i32
    return %c0_i32, %c0_i32_0, %c0_i32_1 : i32, i32, i32
  }
  func.func @transform_4(%arg0: i32) -> (i32, i32) {
    %c0_i32 = arith.constant 0 : i32
    %c0_i32_0 = arith.constant 0 : i32
    %c0_i32_1 = arith.constant 0 : i32
    return %c0_i32, %c0_i32_0 : i32, i32
  }
  func.func @transform_5(%arg0: i32) -> (i32, i32) {
    %c0_i32 = arith.constant 0 : i32
    %c0_i32_0 = arith.constant 0 : i32
    %c0_i32_1 = arith.constant 0 : i32
    return %c0_i32, %c0_i32_0 : i32, i32
  }
  func.func @transform_6(%arg0: i32) -> (i32, i32) {
    %c0_i32 = arith.constant 0 : i32
    %c0_i32_0 = arith.constant 0 : i32
    %c0_i32_1 = arith.constant 0 : i32
    return %c0_i32, %c0_i32_0 : i32, i32
  }
  func.func @transform_7(%arg0: i32) -> (i32, i32) {
    %c0_i32 = arith.constant 0 : i32
    %c0_i32_0 = arith.constant 0 : i32
    return %arg0, %c0_i32 : i32, i32
  }
}

</mosaic_0001>

<bundles_post_ra>
// kernel: tpu_custom_call.1
= control target key start
LH: loop header
LB: loop body
LE: loop exit
PB: predicated region body
PF: predicated region fallthrough
CT: control target
= control target key end

     0   :  { %12 = vsyncpa [#allocation3], 0  ;;  %s1681_s0 = inlined_call_operand.hbm [shape: bf16[16,128], index: 0, kind: input, shape index: {}]   ;;  %s1682_s1 = inlined_call_operand.hbm [shape: bf16[128,512], index: 1, kind: input, shape index: {}]   ;;  %s1683_s2 = inlined_call_operand.hbm [shape: f32[1,512], index: 2, kind: input, shape index: {}]   ;;  %s1684_s3 = inlined_call_operand.hbm [shape: bf16[2,256,256], index: 3, kind: input, shape index: {}]   ;;  %s1685_s4 = inlined_call_operand.hbm [shape: f32[2,256], index: 4, kind: input, shape index: {}]   ;;  %s1686_s5 = inlined_call_operand.vmem [shape: f32[2,256], index: 5, kind: input, shape index: {}]   ;;  %s1687_s6 = inlined_call_operand.vmem [shape: f32[1,2], index: 6, kind: input, shape index: {}]   ;;  %s1688_s7 = inlined_call_operand.vmem [shape: f32[16,2], index: 7, kind: output, shape index: {}]  }
   0x1   :  { %13 = vsyncpa [#allocation5], 0  ;;  %s32_s26 = sshll.u32 %s1682_s1, 4  ;;  %s33_s26 = int_to_ptr.hbm [resolvable:$true] %s32_s26 }
   0x2   :  { %14 = vsyncpa [#allocation8], 0  ;;  %s1594_s27 = smov [#allocation4]   ;;  %s56_s8 = sshll.u32 %s1684_s3, 4  ;;  %s57_s8 = int_to_ptr.hbm [resolvable:$true] %s56_s8 }
   0x3   :  { %s34_s28 = sshll.u32 %s1594_s27, 4  ;;  %s1595_s9 = smov 256   ;;  %s35_s28 = int_to_ptr.vmem [resolvable:$true] %s34_s28 }
   0x4   :  { %s1596_s10 = smov 16   ;;  %s1597_s11 = smov [#allocation7]  }
   0x5   :  { %40 = dma.hbm_to_vmem [thread:$0]  %s33_s26, 4096, %s35_s28, [#allocation5], %s1595_s9, %s1595_s9, %s1596_s10  }
   0x6   :  { %s58_s12 = sshll.u32 %s1597_s11, 4  ;;  %s1598_s13 = smov 128   ;;  %s59_s12 = int_to_ptr.vmem [resolvable:$true] %s58_s12 }
   0x7   :  { %s1599_s14 = smov 8   ;;  %s19_s16 = sshll.u32 %s1681_s0, 4  ;;  %s20_s16 = int_to_ptr.hbm [resolvable:$true] %s19_s16 }
   0x8   :  { %64 = dma.hbm_to_vmem [thread:$0]  %s57_s8, 8192, %s59_s12, [#allocation8], %s1598_s13, %s1598_s13, %s1599_s14  }
   0x9   :  { %s1600_s17 = smov [#allocation2]   ;;  %s46_s20 = sshll.u32 %s1683_s2, 4  ;;  %s47_s20 = int_to_ptr.hbm [resolvable:$true] %s46_s20 }
   0xa   :  { %s21_s18 = sshll.u32 %s1600_s17, 4  ;;  %s1601_s21 = smov 64   ;;  %s22_s18 = int_to_ptr.vmem [resolvable:$true] %s21_s18 }
   0xb   :  { %s1602_s22 = smov 4   ;;  %s1603_s23 = smov [#allocation6]  }
   0xc   :  { %27 = dma.hbm_to_vmem [thread:$0]  %s20_s16, 128, %s22_s18, [#allocation3], %s1601_s21, %s1601_s21, %s1602_s22  }
   0xd   :  { %s48_s24 = sshll.u32 %s1603_s23, 4  ;;  %s70_s27 = sshll.u32 %s1685_s4, 4  ;;  %s49_s24 = int_to_ptr.vmem [resolvable:$true] %s48_s24  ;;  %s71_s27 = int_to_ptr.hbm [resolvable:$true] %s70_s27 }
   0xe   :  { %51 = dma.hbm_to_vmem [thread:$0]  %s47_s20, 64, %s49_s24, [#allocation5]  }
   0xf   :  { %s1604_s0 = smov [#allocation9]  }
  0x10   :  { %s72_s28 = sshll.u32 %s1604_s0, 4  ;;  %s73_s28 = int_to_ptr.vmem [resolvable:$true] %s72_s28 }
  0x11   :  { %75 = dma.hbm_to_vmem [thread:$0]  %s71_s27, 64, %s73_s28, [#allocation8]  }
  0x12   :  { %1588 = dma.done.wait [#allocation3], 128  }
  0x13   :  { %1589 = vsyncadd [#allocation3], 4294967168 }
  0x14   :  { %1590 = dma.done.wait [#allocation5], 4160  }
  0x15   :  { %1591 = vsyncadd [#allocation5], 4294963136 }
  0x16   :  { %1592 = dma.done.wait [#allocation8], 8256  }
  0x17   :  { %1593 = vsyncadd [#allocation8], 4294959040  ;;  %v1088_v0 = vld [vmem:[#allocation4 + $0xe0] sm:$0xf]  ;;  %v1390_v1 = vld [vmem:[#allocation4 + $0xec] sm:$0xf0] }
  0x18   :  { %v1388_v2 = vld [vmem:[#allocation4 + $0xe4] sm:$0xf]  ;;  %v1089_v3 = vor.u32 %v1390_v1, %v1088_v0  ;;  %v1090_v4 = vld [vmem:[#allocation4 + $0xf0] sm:$0xf0]  ;;  %v1096_v5 = vld [vmem:[#allocation4 + $0xe8] sm:$0xf] }
  0x19   :  { %v1391_v6 = vld [vmem:[#allocation4 + $0xf4] sm:$0xf0]  ;;  %v1093_v7 = vor.u32 %v1388_v2, %v1090_v4  ;;  %v1389_v9 = vld [vmem:[#allocation4 + $0xec] sm:$0xf]  ;;  %v1098_v10 = vld [vmem:[#allocation4 + $0xf8] sm:$0xf0] }
  0x1a   :  { %v1097_v8 = vor.u32 %v1391_v6, %v1096_v5  ;;  %v1072_v11 = vld [vmem:[#allocation4 + $0xc0] sm:$0xf]  ;;  %310 = vmatpush.bf16.msra.mxu0 %v1089_v3  ;;  %v1101_v12 = vor.u32 %v1389_v9, %v1098_v10  ;;  %v1386_v13 = vld [vmem:[#allocation4 + $0xcc] sm:$0xf0]  ;;  %v1384_v14 = vld [vmem:[#allocation4 + $0xc4] sm:$0xf] }
  0x1b   :  { %v1074_v15 = vld [vmem:[#allocation4 + $0xd0] sm:$0xf0]  ;;  %324 = vmatpush.bf16.msra.mxu1 %v1093_v7  ;;  %v1073_v16 = vor.u32 %v1386_v13, %v1072_v11  ;;  %v1080_v18 = vld [vmem:[#allocation4 + $0xc8] sm:$0xf]  ;;  %v1387_v19 = vld [vmem:[#allocation4 + $0xd4] sm:$0xf0] }
  0x1c   :  { %338 = vmatpush.bf16.msra.mxu2 %v1097_v8  ;;  %v1077_v17 = vor.u32 %v1384_v14, %v1074_v15  ;;  %v1385_v20 = vld [vmem:[#allocation4 + $0xcc] sm:$0xf]  ;;  %352 = vmatpush.bf16.msra.mxu3 %v1101_v12  ;;  %v1081_v21 = vor.u32 %v1387_v19, %v1080_v18  ;;  %v1082_v22 = vld [vmem:[#allocation4 + $0xd8] sm:$0xf0]  ;;  %v1056_v23 = vld [vmem:[#allocation4 + $0xa0] sm:$0xf] }
  0x1d   :  { %v1382_v24 = vld [vmem:[#allocation4 + $0xac] sm:$0xf0]  ;;  %v1085_v25 = vor.u32 %v1385_v20, %v1082_v22  ;;  %v1380_v26 = vld [vmem:[#allocation4 + $0xa4] sm:$0xf]  ;;  %v1058_v27 = vld [vmem:[#allocation4 + $0xb0] sm:$0xf0] }
  0x1e   :  { %v1064_v28 = vld [vmem:[#allocation4 + $0xa8] sm:$0xf]  ;;  %311 = vmatpush.bf16.msra.mxu0 %v1073_v16  ;;  %v1057_v29 = vor.u32 %v1382_v24, %v1056_v23  ;;  %v1383_v30 = vld [vmem:[#allocation4 + $0xb4] sm:$0xf0]  ;;  %v1381_v31 = vld [vmem:[#allocation4 + $0xac] sm:$0xf]  ;;  %v1061_v33 = vor.u32 %v1380_v26, %v1058_v27 }
  0x1f   :  { %v1066_v32 = vld [vmem:[#allocation4 + $0xb8] sm:$0xf0]  ;;  %325 = vmatpush.bf16.msra.mxu1 %v1077_v17  ;;  %v1065_v34 = vor.u32 %v1383_v30, %v1064_v28  ;;  %v1040_v35 = vld [vmem:[#allocation4 + $0x80] sm:$0xf]  ;;  %v1378_v36 = vld [vmem:[#allocation4 + $0x8c] sm:$0xf0] }
  0x20   :  { %339 = vmatpush.bf16.msra.mxu2 %v1081_v21  ;;  %v1376_v37 = vld [vmem:[#allocation4 + $0x84] sm:$0xf]  ;;  %353 = vmatpush.bf16.msra.mxu3 %v1085_v25  ;;  %v1069_v38 = vor.u32 %v1381_v31, %v1066_v32  ;;  %v1042_v39 = vld [vmem:[#allocation4 + $0x90] sm:$0xf0]  ;;  %v1048_v40 = vld [vmem:[#allocation4 + $0x88] sm:$0xf]  ;;  %v1041_v44 = vor.u32 %v1378_v36, %v1040_v35 }
  0x21   :  { %v1379_v41 = vld [vmem:[#allocation4 + $0x94] sm:$0xf0]  ;;  %v1377_v42 = vld [vmem:[#allocation4 + $0x8c] sm:$0xf]  ;;  %v1050_v43 = vld [vmem:[#allocation4 + $0x98] sm:$0xf0]  ;;  %v1045_v45 = vor.u32 %v1376_v37, %v1042_v39 }
  0x22   :  { %312 = vmatpush.bf16.msra.mxu0 %v1057_v29  ;;  %v1049_v46 = vor.u32 %v1379_v41, %v1048_v40  ;;  %v1024_v47 = vld [vmem:[#allocation4 + $0x60] sm:$0xf]  ;;  %v1374_v48 = vld [vmem:[#allocation4 + $0x6c] sm:$0xf0]  ;;  %v1372_v49 = vld [vmem:[#allocation4 + $0x64] sm:$0xf]  ;;  %v1053_v50 = vor.u32 %v1377_v42, %v1050_v43 }
  0x23   :  { %326 = vmatpush.bf16.msra.mxu1 %v1061_v33  ;;  %v1026_v51 = vld [vmem:[#allocation4 + $0x70] sm:$0xf0]  ;;  %v1032_v52 = vld [vmem:[#allocation4 + $0x68] sm:$0xf]  ;;  %v1375_v53 = vld [vmem:[#allocation4 + $0x74] sm:$0xf0]  ;;  %v1025_v56 = vor.u32 %v1374_v48, %v1024_v47 }
  0x24   :  { %340 = vmatpush.bf16.msra.mxu2 %v1065_v34  ;;  %354 = vmatpush.bf16.msra.mxu3 %v1069_v38  ;;  %v1373_v54 = vld [vmem:[#allocation4 + $0x6c] sm:$0xf]  ;;  %v1034_v55 = vld [vmem:[#allocation4 + $0x78] sm:$0xf0]  ;;  %v1029_v57 = vor.u32 %v1372_v49, %v1026_v51  ;;  %v1033_v58 = vor.u32 %v1375_v53, %v1032_v52  ;;  %v1008_v59 = vld [vmem:[#allocation4 + $0x40] sm:$0xf] }
  0x25   :  { %v1370_v60 = vld [vmem:[#allocation4 + $0x4c] sm:$0xf0]  ;;  %v1368_v61 = vld [vmem:[#allocation4 + $0x44] sm:$0xf]  ;;  %v1037_v62 = vor.u32 %v1373_v54, %v1034_v55  ;;  %v1010_v63 = vld [vmem:[#allocation4 + $0x50] sm:$0xf0] }
  0x26   :  { %313 = vmatpush.bf16.msra.mxu0 %v1041_v44  ;;  %v1016_v0 = vld [vmem:[#allocation4 + $0x48] sm:$0xf]  ;;  %v1371_v1 = vld [vmem:[#allocation4 + $0x54] sm:$0xf0]  ;;  %v1369_v2 = vld [vmem:[#allocation4 + $0x4c] sm:$0xf]  ;;  %v1009_v4 = vor.u32 %v1370_v60, %v1008_v59  ;;  %v1013_v5 = vor.u32 %v1368_v61, %v1010_v63 }
  0x27   :  { %327 = vmatpush.bf16.msra.mxu1 %v1045_v45  ;;  %v1018_v3 = vld [vmem:[#allocation4 + $0x58] sm:$0xf0]  ;;  %v1017_v6 = vor.u32 %v1371_v1, %v1016_v0  ;;  %v992_v7 = vld [vmem:[#allocation4 + $0x20] sm:$0xf]  ;;  %v1366_v8 = vld [vmem:[#allocation4 + $0x2c] sm:$0xf0] }
  0x28   :  { %341 = vmatpush.bf16.msra.mxu2 %v1049_v46  ;;  %355 = vmatpush.bf16.msra.mxu3 %v1053_v50  ;;  %v1364_v9 = vld [vmem:[#allocation4 + $0x24] sm:$0xf]  ;;  %v1021_v10 = vor.u32 %v1369_v2, %v1018_v3  ;;  %v994_v11 = vld [vmem:[#allocation4 + $0x30] sm:$0xf0]  ;;  %v1000_v12 = vld [vmem:[#allocation4 + $0x28] sm:$0xf]  ;;  %v993_v16 = vor.u32 %v1366_v8, %v992_v7 }
  0x29   :  { %v1367_v13 = vld [vmem:[#allocation4 + $0x34] sm:$0xf0]  ;;  %v1365_v14 = vld [vmem:[#allocation4 + $0x2c] sm:$0xf]  ;;  %v1002_v15 = vld [vmem:[#allocation4 + $0x38] sm:$0xf0]  ;;  %v997_v18 = vor.u32 %v1364_v9, %v994_v11 }
  0x2a   :  { %314 = vmatpush.bf16.msra.mxu0 %v1025_v56  ;;  %v976_v17 = vld [vmem:[#allocation4] sm:$0xf]  ;;  %v1001_v19 = vor.u32 %v1367_v13, %v1000_v12  ;;  %v1362_v20 = vld [vmem:[#allocation4 + $0xc] sm:$0xf0]  ;;  %v1360_v21 = vld [vmem:[#allocation4 + $0x4] sm:$0xf]  ;;  %v1005_v23 = vor.u32 %v1365_v14, %v1002_v15 }
  0x2b   :  { %328 = vmatpush.bf16.msra.mxu1 %v1029_v57  ;;  %v978_v22 = vld [vmem:[#allocation4 + $0x10] sm:$0xf0]  ;;  %v984_v24 = vld [vmem:[#allocation4 + $0x8] sm:$0xf]  ;;  %v1363_v25 = vld [vmem:[#allocation4 + $0x14] sm:$0xf0]  ;;  %v977_v30 = vor.u32 %v1362_v20, %v976_v17 }
  0x2c   :  { %342 = vmatpush.bf16.msra.mxu2 %v1033_v58  ;;  %356 = vmatpush.bf16.msra.mxu3 %v1037_v62  ;;  %v1361_v26 = vld [vmem:[#allocation4 + $0xc] sm:$0xf]  ;;  %v986_v27 = vld [vmem:[#allocation4 + $0x18] sm:$0xf0]  ;;  %v1160_v28 = vld [vmem:[#allocation7 + $0x70] sm:$0xf]  ;;  %v981_v33 = vor.u32 %v1360_v21, %v978_v22  ;;  %v985_v34 = vor.u32 %v1363_v25, %v984_v24 }
  0x2d   :  { %v1407_v29 = vld [vmem:[#allocation7 + $0x74] sm:$0xf0]  ;;  %v1224_v31 = vld [vmem:[#allocation7 + $0xf0] sm:$0xf]  ;;  %v989_v36 = vor.u32 %v1361_v26, %v986_v27  ;;  %v1406_v38 = vld [vmem:[#allocation7 + $0x74] sm:$0xf] }
  0x2e   :  { %315 = vmatpush.bf16.msra.mxu0 %v1009_v4  ;;  %v1423_v32 = vld [vmem:[#allocation7 + $0xf4] sm:$0xf0]  ;;  %v1161_v37 = vor.u32 %v1407_v29, %v1160_v28  ;;  %v1162_v39 = vld [vmem:[#allocation7 + $0x78] sm:$0xf0]  ;;  %v1422_v40 = vld [vmem:[#allocation7 + $0xf4] sm:$0xf] }
  0x2f   :  { %329 = vmatpush.bf16.msra.mxu1 %v1013_v5  ;;  %v1359_v35 = vld [vmem:[#allocation2] sm:$0xff]  ;;  %v1225_v41 = vor.u32 %v1423_v32, %v1224_v31  ;;  %v1226_v42 = vld [vmem:[#allocation7 + $0xf8] sm:$0xf0]  ;;  %v1152_v43 = vld [vmem:[#allocation7 + $0x60] sm:$0xf]  ;;  %v1165_v47 = vor.u32 %v1406_v38, %v1162_v39  ;;  %vm960_vm1 = vcmask 15360  }
  0x30   :  { %343 = vmatpush.bf16.msra.mxu2 %v1017_v6  ;;  %357 = vmatpush.bf16.msra.mxu3 %v1021_v10  ;;  %v1405_v44 = vld [vmem:[#allocation7 + $0x64] sm:$0xf0]  ;;  %v1216_v45 = vld [vmem:[#allocation7 + $0xe0] sm:$0xf]  ;;  %v1229_v48 = vor.u32 %v1422_v40, %v1226_v42  ;;  %v1404_v50 = vld [vmem:[#allocation7 + $0x64] sm:$0xf] }
  0x31   :  { %v1421_v46 = vld [vmem:[#allocation7 + $0xe4] sm:$0xf0]  ;;  %v1153_v49 = vor.u32 %v1405_v44, %v1152_v43  ;;  %v1154_v51 = vld [vmem:[#allocation7 + $0x68] sm:$0xf0]  ;;  %v1420_v52 = vld [vmem:[#allocation7 + $0xe4] sm:$0xf] }
  0x32   :  { %316 = vmatpush.bf16.msra.mxu0 %v993_v16  ;;  %v1217_v53 = vor.u32 %v1421_v46, %v1216_v45  ;;  %v1218_v54 = vld [vmem:[#allocation7 + $0xe8] sm:$0xf0]  ;;  %v1144_v55 = vld [vmem:[#allocation7 + $0x50] sm:$0xf]  ;;  %v1403_v56 = vld [vmem:[#allocation7 + $0x54] sm:$0xf0]  ;;  %v1157_v59 = vor.u32 %v1404_v50, %v1154_v51 }
  0x33   :  { %330 = vmatpush.bf16.msra.mxu1 %v997_v18  ;;  %v1208_v57 = vld [vmem:[#allocation7 + $0xd0] sm:$0xf]  ;;  %v1419_v58 = vld [vmem:[#allocation7 + $0xd4] sm:$0xf0]  ;;  %v1221_v60 = vor.u32 %v1420_v52, %v1218_v54  ;;  %v1145_v61 = vor.u32 %v1403_v56, %v1144_v55  ;;  %v1402_v62 = vld [vmem:[#allocation7 + $0x54] sm:$0xf] }
  0x34   :  { %344 = vmatpush.bf16.msra.mxu2 %v1001_v19  ;;  %358 = vmatpush.bf16.msra.mxu3 %v1005_v23  ;;  %v1146_v63 = vld [vmem:[#allocation7 + $0x58] sm:$0xf0]  ;;  %v1418_v0 = vld [vmem:[#allocation7 + $0xd4] sm:$0xf]  ;;  %v1209_v1 = vor.u32 %v1419_v58, %v1208_v57  ;;  %v1136_v3 = vld [vmem:[#allocation7 + $0x40] sm:$0xf] }
  0x35   :  { %v1210_v2 = vld [vmem:[#allocation7 + $0xd8] sm:$0xf0]  ;;  %v1401_v4 = vld [vmem:[#allocation7 + $0x44] sm:$0xf0]  ;;  %v1200_v5 = vld [vmem:[#allocation7 + $0xc0] sm:$0xf]  ;;  %v1149_v7 = vor.u32 %v1402_v62, %v1146_v63 }
  0x36   :  { %317 = vmatpush.bf16.msra.mxu0 %v977_v30  ;;  %v1417_v6 = vld [vmem:[#allocation7 + $0xc4] sm:$0xf0]  ;;  %v1213_v8 = vor.u32 %v1418_v0, %v1210_v2  ;;  %v1137_v9 = vor.u32 %v1401_v4, %v1136_v3  ;;  %v1400_v10 = vld [vmem:[#allocation7 + $0x44] sm:$0xf]  ;;  %v1138_v11 = vld [vmem:[#allocation7 + $0x48] sm:$0xf0] }
  0x37   :  { %331 = vmatpush.bf16.msra.mxu1 %v981_v33  ;;  %v1416_v12 = vld [vmem:[#allocation7 + $0xc4] sm:$0xf]  ;;  %v1201_v13 = vor.u32 %v1417_v6, %v1200_v5  ;;  %v1202_v14 = vld [vmem:[#allocation7 + $0xc8] sm:$0xf0]  ;;  %v1128_v15 = vld [vmem:[#allocation7 + $0x30] sm:$0xf]  ;;  %v1141_v19 = vor.u32 %v1400_v10, %v1138_v11 }
  0x38   :  { %345 = vmatpush.bf16.msra.mxu2 %v985_v34  ;;  %359 = vmatpush.bf16.msra.mxu3 %v989_v36  ;;  %v1399_v16 = vld [vmem:[#allocation7 + $0x34] sm:$0xf0]  ;;  %v1192_v17 = vld [vmem:[#allocation7 + $0xb0] sm:$0xf]  ;;  %v1205_v20 = vor.u32 %v1416_v12, %v1202_v14  ;;  %v1398_v22 = vld [vmem:[#allocation7 + $0x34] sm:$0xf] }
  0x39   :  { %318 = vmatmul.bf16.vlgmr.msra.gmra.mxu0 %v1359_v35  ;;  %v1415_v18 = vld [vmem:[#allocation7 + $0xb4] sm:$0xf0]  ;;  %v1129_v21 = vor.u32 %v1399_v16, %v1128_v15  ;;  %v1130_v23 = vld [vmem:[#allocation7 + $0x38] sm:$0xf0]  ;;  %v1414_v24 = vld [vmem:[#allocation7 + $0xb4] sm:$0xf] }
  0x3a   :  { %586 = vmatpush.bf16.msrb.mxu0 %v1161_v37  ;;  %332 = vmatmul.bf16.vlgmr.msra.gmra.mxu1 %v1359_v35  ;;  %v1193_v25 = vor.u32 %v1415_v18, %v1192_v17  ;;  %v1194_v26 = vld [vmem:[#allocation7 + $0xb8] sm:$0xf0]  ;;  %v1120_v27 = vld [vmem:[#allocation7 + $0x20] sm:$0xf]  ;;  %v1397_v28 = vld [vmem:[#allocation7 + $0x24] sm:$0xf0]  ;;  %v1133_v31 = vor.u32 %v1398_v22, %v1130_v23 }
  0x3b   :  { %600 = vmatpush.bf16.msrb.mxu1 %v1225_v41  ;;  %346 = vmatmul.bf16.vlgmr.msra.gmra.mxu2 %v1359_v35  ;;  %v1184_v29 = vld [vmem:[#allocation7 + $0xa0] sm:$0xf]  ;;  %v1413_v30 = vld [vmem:[#allocation7 + $0xa4] sm:$0xf0]  ;;  %v1197_v32 = vor.u32 %v1414_v24, %v1194_v26  ;;  %v1121_v33 = vor.u32 %v1397_v28, %v1120_v27  ;;  %v1396_v34 = vld [vmem:[#allocation7 + $0x24] sm:$0xf] }
  0x3c   :  { %360 = vmatmul.bf16.vlgmr.msra.gmra.mxu3 %v1359_v35  ;;  %614 = vmatpush.bf16.msrb.mxu2 %v1165_v47  ;;  %v1122_v35 = vld [vmem:[#allocation7 + $0x28] sm:$0xf0]  ;;  %v1412_v36 = vld [vmem:[#allocation7 + $0xa4] sm:$0xf]  ;;  %v1185_v37 = vor.u32 %v1413_v30, %v1184_v29  ;;  %v1112_v39 = vld [vmem:[#allocation7 + $0x10] sm:$0xf] }
  0x3d   :  { %628 = vmatpush.bf16.msrb.mxu3 %v1229_v48  ;;  %v1186_v38 = vld [vmem:[#allocation7 + $0xa8] sm:$0xf0]  ;;  %v1395_v40 = vld [vmem:[#allocation7 + $0x14] sm:$0xf0]  ;;  %v1176_v41 = vld [vmem:[#allocation7 + $0x90] sm:$0xf]  ;;  %v1125_v43 = vor.u32 %v1396_v34, %v1122_v35 }
  0x3e   :  { %587 = vmatpush.bf16.msrb.mxu0 %v1153_v49  ;;  %v1411_v42 = vld [vmem:[#allocation7 + $0x94] sm:$0xf0]  ;;  %v1189_v44 = vor.u32 %v1412_v36, %v1186_v38  ;;  %v1113_v45 = vor.u32 %v1395_v40, %v1112_v39  ;;  %v1394_v46 = vld [vmem:[#allocation7 + $0x14] sm:$0xf]  ;;  %v1114_v47 = vld [vmem:[#allocation7 + $0x18] sm:$0xf0] }
  0x3f   :  { %601 = vmatpush.bf16.msrb.mxu1 %v1217_v53  ;;  %v1177_v48 = vor.u32 %v1411_v42, %v1176_v41  ;;  %v1410_v49 = vld [vmem:[#allocation7 + $0x94] sm:$0xf]  ;;  %v1178_v50 = vld [vmem:[#allocation7 + $0x98] sm:$0xf0]  ;;  %v1117_v51 = vor.u32 %v1394_v46, %v1114_v47  ;;  %v1104_v53 = vld [vmem:[#allocation7] sm:$0xf] }
  0x40   :  { %615 = vmatpush.bf16.msrb.mxu2 %v1157_v59  ;;  %v1181_v52 = vor.u32 %v1410_v49, %v1178_v50  ;;  %v1393_v54 = vld [vmem:[#allocation7 + $0x4] sm:$0xf0]  ;;  %v1168_v55 = vld [vmem:[#allocation7 + $0x80] sm:$0xf]  ;;  %v1392_v58 = vld [vmem:[#allocation7 + $0x4] sm:$0xf] }
  0x41   :  { %629 = vmatpush.bf16.msrb.mxu3 %v1221_v60  ;;  %v1105_v56 = vor.u32 %v1393_v54, %v1104_v53  ;;  %v1409_v57 = vld [vmem:[#allocation7 + $0x84] sm:$0xf0]  ;;  %v1106_v59 = vld [vmem:[#allocation7 + $0x8] sm:$0xf0]  ;;  %v1408_v62 = vld [vmem:[#allocation7 + $0x84] sm:$0xf] }
  0x42   :  { %588 = vmatpush.bf16.msrb.mxu0 %v1145_v61  ;;  %v1169_v60 = vor.u32 %v1409_v57, %v1168_v55  ;;  %v1109_v61 = vor.u32 %v1392_v58, %v1106_v59  ;;  %v1170_v63 = vld [vmem:[#allocation7 + $0x88] sm:$0xf0]  ;;  %v1288_v0 = vld [vmem:[#allocation7 + $0x170] sm:$0xf]  ;;  %v1439_v2 = vld [vmem:[#allocation7 + $0x174] sm:$0xf0] }
  0x43   :  { %602 = vmatpush.bf16.msrb.mxu1 %v1209_v1  ;;  %v1173_v1 = vor.u32 %v1408_v62, %v1170_v63  ;;  %v1352_v3 = vld [vmem:[#allocation7 + $0x1f0] sm:$0xf]  ;;  %v1455_v4 = vld [vmem:[#allocation7 + $0x1f4] sm:$0xf0]  ;;  %v1289_v5 = vor.u32 %v1439_v2, %v1288_v0  ;;  %v1354_v11 = vld [vmem:[#allocation7 + $0x1f8] sm:$0xf0] }
  0x44   :  { %616 = vmatpush.bf16.msrb.mxu2 %v1149_v7  ;;  %v1353_v6 = vor.u32 %v1455_v4, %v1352_v3  ;;  %v1438_v7 = vld [vmem:[#allocation7 + $0x174] sm:$0xf]  ;;  %v1280_v12 = vld [vmem:[#allocation7 + $0x160] sm:$0xf]  ;;  %v1453_v17 = vld [vmem:[#allocation7 + $0x1e4] sm:$0xf0] }
  0x45   :  { %630 = vmatpush.bf16.msrb.mxu3 %v1213_v8  ;;  %v1290_v8 = vld [vmem:[#allocation7 + $0x178] sm:$0xf0]  ;;  %v1344_v16 = vld [vmem:[#allocation7 + $0x1e0] sm:$0xf]  ;;  %v1436_v18 = vld [vmem:[#allocation7 + $0x164] sm:$0xf] }
  0x46   :  { %589 = vmatpush.bf16.msrb.mxu0 %v1137_v9  ;;  %v1454_v9 = vld [vmem:[#allocation7 + $0x1f4] sm:$0xf]  ;;  %v1293_v10 = vor.u32 %v1438_v7, %v1290_v8  ;;  %v1346_v22 = vld [vmem:[#allocation7 + $0x1e8] sm:$0xf0]  ;;  %v1435_v26 = vld [vmem:[#allocation7 + $0x154] sm:$0xf0] }
  0x47   :  { %603 = vmatpush.bf16.msrb.mxu1 %v1201_v13  ;;  %v1437_v13 = vld [vmem:[#allocation7 + $0x164] sm:$0xf0]  ;;  %v1357_v14 = vor.u32 %v1454_v9, %v1354_v11  ;;  %v1336_v27 = vld [vmem:[#allocation7 + $0x1d0] sm:$0xf]  ;;  %v1451_v29 = vld [vmem:[#allocation7 + $0x1d4] sm:$0xf0] }
  0x48   :  { %617 = vmatpush.bf16.msrb.mxu2 %v1141_v19  ;;  %v1281_v15 = vor.u32 %v1437_v13, %v1280_v12  ;;  %v1345_v19 = vor.u32 %v1453_v17, %v1344_v16  ;;  %v1434_v30 = vld [vmem:[#allocation7 + $0x154] sm:$0xf]  ;;  %v1338_v35 = vld [vmem:[#allocation7 + $0x1d8] sm:$0xf0]  ;;  %v1433_v38 = vld [vmem:[#allocation7 + $0x144] sm:$0xf0] }
  0x49   :  { %631 = vmatpush.bf16.msrb.mxu3 %v1205_v20  ;;  %v1282_v20 = vld [vmem:[#allocation7 + $0x168] sm:$0xf0]  ;;  %v1450_v34 = vld [vmem:[#allocation7 + $0x1d4] sm:$0xf]  ;;  %v1328_v39 = vld [vmem:[#allocation7 + $0x1c0] sm:$0xf] }
  0x4a   :  { %590 = vmatpush.bf16.msrb.mxu0 %v1129_v21  ;;  %v1452_v21 = vld [vmem:[#allocation7 + $0x1e4] sm:$0xf]  ;;  %v1285_v23 = vor.u32 %v1436_v18, %v1282_v20  ;;  %v1341_v36 = vor.u32 %v1450_v34, %v1338_v35  ;;  %v1449_v41 = vld [vmem:[#allocation7 + $0x1c4] sm:$0xf0]  ;;  %v1330_v47 = vld [vmem:[#allocation7 + $0x1c8] sm:$0xf0] }
  0x4b   :  { %604 = vmatpush.bf16.msrb.mxu1 %v1193_v25  ;;  %v1349_v24 = vor.u32 %v1452_v21, %v1346_v22  ;;  %v1272_v25 = vld [vmem:[#allocation7 + $0x150] sm:$0xf]  ;;  %v1432_v42 = vld [vmem:[#allocation7 + $0x144] sm:$0xf]  ;;  %v1431_v50 = vld [vmem:[#allocation7 + $0x134] sm:$0xf0] }
  0x4c   :  { %618 = vmatpush.bf16.msrb.mxu2 %v1133_v31  ;;  %v1273_v28 = vor.u32 %v1435_v26, %v1272_v25  ;;  %v1274_v31 = vld [vmem:[#allocation7 + $0x158] sm:$0xf0]  ;;  %v1448_v46 = vld [vmem:[#allocation7 + $0x1c4] sm:$0xf]  ;;  %v1256_v49 = vld [vmem:[#allocation7 + $0x130] sm:$0xf] }
  0x4d   :  { %632 = vmatpush.bf16.msrb.mxu3 %v1197_v32  ;;  %v1337_v32 = vor.u32 %v1451_v29, %v1336_v27  ;;  %v1447_v53 = vld [vmem:[#allocation7 + $0x1b4] sm:$0xf0]  ;;  %v1430_v54 = vld [vmem:[#allocation7 + $0x134] sm:$0xf]  ;;  %v1258_v55 = vld [vmem:[#allocation7 + $0x138] sm:$0xf0] }
  0x4e   :  { %591 = vmatpush.bf16.msrb.mxu0 %v1121_v33  ;;  %v1277_v33 = vor.u32 %v1434_v30, %v1274_v31  ;;  %v1261_v57 = vor.u32 %v1430_v54, %v1258_v55  ;;  %v1446_v58 = vld [vmem:[#allocation7 + $0x1b4] sm:$0xf]  ;;  %v1322_v59 = vld [vmem:[#allocation7 + $0x1b8] sm:$0xf0]  ;;  %v1429_v62 = vld [vmem:[#allocation7 + $0x124] sm:$0xf0] }
  0x4f   :  { %605 = vmatpush.bf16.msrb.mxu1 %v1185_v37  ;;  %v1264_v37 = vld [vmem:[#allocation7 + $0x140] sm:$0xf]  ;;  %v1428_v2 = vld [vmem:[#allocation7 + $0x124] sm:$0xf]  ;;  %v1250_v3 = vld [vmem:[#allocation7 + $0x128] sm:$0xf0] }
  0x50   :  { %619 = vmatpush.bf16.msrb.mxu2 %v1125_v43  ;;  %v1265_v40 = vor.u32 %v1433_v38, %v1264_v37  ;;  %v1266_v43 = vld [vmem:[#allocation7 + $0x148] sm:$0xf0]  ;;  %v1312_v63 = vld [vmem:[#allocation7 + $0x1a0] sm:$0xf]  ;;  %v1240_v8 = vld [vmem:[#allocation7 + $0x110] sm:$0xf] }
  0x51   :  { %633 = vmatpush.bf16.msrb.mxu3 %v1189_v44  ;;  %v1329_v44 = vor.u32 %v1449_v41, %v1328_v39  ;;  %v1314_v7 = vld [vmem:[#allocation7 + $0x1a8] sm:$0xf0]  ;;  %v1304_v11 = vld [vmem:[#allocation7 + $0x190] sm:$0xf]  ;;  %v1443_v12 = vld [vmem:[#allocation7 + $0x194] sm:$0xf0] }
  0x52   :  { %592 = vmatpush.bf16.msrb.mxu0 %v1113_v45  ;;  %v1269_v45 = vor.u32 %v1432_v42, %v1266_v43  ;;  %v1660_v13 = vld [vmem:[#allocation6] sm:$0xf]  ;;  %v1426_v16 = vld [vmem:[#allocation7 + $0x114] sm:$0xf]  ;;  %v1232_v21 = vld [vmem:[#allocation7 + $0x100] sm:$0xf] }
  0x53   :  { %606 = vmatpush.bf16.msrb.mxu1 %v1177_v48  ;;  %v1333_v48 = vor.u32 %v1448_v46, %v1330_v47  ;;  %v1242_v17 = vld [vmem:[#allocation7 + $0x118] sm:$0xf0]  ;;  %v1442_v18 = vld [vmem:[#allocation7 + $0x194] sm:$0xf]  ;;  %v1425_v22 = vld [vmem:[#allocation7 + $0x104] sm:$0xf0] }
  0x54   :  { %620 = vmatpush.bf16.msrb.mxu2 %v1117_v51  ;;  %v1320_v51 = vld [vmem:[#allocation7 + $0x1b0] sm:$0xf]  ;;  %v1306_v20 = vld [vmem:[#allocation7 + $0x198] sm:$0xf0]  ;;  %v1441_v25 = vld [vmem:[#allocation7 + $0x184] sm:$0xf0]  ;;  %v1233_v30 = vor.u32 %v1425_v22, %v1232_v21 }
  0x55   :  { %634 = vmatpush.bf16.msrb.mxu3 %v1181_v52  ;;  %v1257_v52 = vor.u32 %v1431_v50, %v1256_v49  ;;  %v1424_v26 = vld [vmem:[#allocation7 + $0x104] sm:$0xf]  ;;  %v1234_v27 = vld [vmem:[#allocation7 + $0x108] sm:$0xf0]  ;;  %v137_v34 = vperm.slane %v1660_v13, 1 }
  0x56   :  { %593 = vmatpush.bf16.msrb.mxu0 %v1105_v56  ;;  %v1321_v56 = vor.u32 %v1447_v53, %v1320_v51  ;;  %v1298_v29 = vld [vmem:[#allocation7 + $0x188] sm:$0xf0]  ;;  %v1237_v35 = vor.u32 %v1424_v26, %v1234_v27  ;;  %v138_v51 = vperm.slane %v1660_v13, 2  ;;  %v916_v21 = vld [vmem:[%s1686_s5] ss:$2 sm:$0x3] }
  0x57   :  { %607 = vmatpush.bf16.msrb.mxu1 %v1169_v60  ;;  %v1325_v60 = vor.u32 %v1446_v58, %v1322_v59  ;;  %v918_v27 = vperm.slane %v916_v21, 0 }
  0x58   :  { %621 = vmatpush.bf16.msrb.mxu2 %v1109_v61  ;;  %v1248_v61 = vld [vmem:[#allocation7 + $0x120] sm:$0xf] }
  0x59   :  { %635 = vmatpush.bf16.msrb.mxu3 %v1173_v1  ;;  %v1249_v0 = vor.u32 %v1429_v62, %v1248_v61  ;;  %v1445_v1 = vld [vmem:[#allocation7 + $0x1a4] sm:$0xf0] }
  0x5a   :  { %856 = vmatpush.bf16.msra.mxu0 %v1289_v5  ;;  %v1313_v4 = vor.u32 %v1445_v1, %v1312_v63  ;;  %v1253_v5 = vor.u32 %v1428_v2, %v1250_v3 }
  0x5b   :  { %870 = vmatpush.bf16.msra.mxu1 %v1353_v6  ;;  %v1444_v6 = vld [vmem:[#allocation7 + $0x1a4] sm:$0xf] }
  0x5c   :  { %884 = vmatpush.bf16.msra.mxu2 %v1293_v10  ;;  %v1317_v9 = vor.u32 %v1444_v6, %v1314_v7  ;;  %v1427_v10 = vld [vmem:[#allocation7 + $0x114] sm:$0xf0] }
  0x5d   :  { %898 = vmatpush.bf16.msra.mxu3 %v1357_v14  ;;  %v1241_v14 = vor.u32 %v1427_v10, %v1240_v8 }
  0x5e   :  { %857 = vmatpush.bf16.msra.mxu0 %v1281_v15  ;;  %v1305_v15 = vor.u32 %v1443_v12, %v1304_v11 }
  0x5f   :  { %871 = vmatpush.bf16.msra.mxu1 %v1345_v19  ;;  %v1245_v19 = vor.u32 %v1426_v16, %v1242_v17 }
  0x60   :  { %885 = vmatpush.bf16.msra.mxu2 %v1285_v23  ;;  %v1309_v23 = vor.u32 %v1442_v18, %v1306_v20 }
  0x61   :  { %899 = vmatpush.bf16.msra.mxu3 %v1349_v24  ;;  %v1296_v24 = vld [vmem:[#allocation7 + $0x180] sm:$0xf] }
  0x62   :  { %858 = vmatpush.bf16.msra.mxu0 %v1273_v28  ;;  %v1440_v28 = vld [vmem:[#allocation7 + $0x184] sm:$0xf]  ;;  %v1297_v31 = vor.u32 %v1441_v25, %v1296_v24 }
  0x63   :  { %872 = vmatpush.bf16.msra.mxu1 %v1337_v32  ;;  %v136_v32 = vperm.slane %v1660_v13, 0  ;;  %v1301_v37 = vor.u32 %v1440_v28, %v1298_v29 }
  0x64   :  { %886 = vmatpush.bf16.msra.mxu2 %v1277_v33 }
  0x65   :  { %900 = vmatpush.bf16.msra.mxu3 %v1341_v36 }
  0x66   :  { %859 = vmatpush.bf16.msra.mxu0 %v1265_v40 }
  0x67   :  { %873 = vmatpush.bf16.msra.mxu1 %v1329_v44 }
  0x68   :  { %887 = vmatpush.bf16.msra.mxu2 %v1269_v45 }
  0x69   :  { %901 = vmatpush.bf16.msra.mxu3 %v1333_v48 }
  0x6a   :  { %860 = vmatpush.bf16.msra.mxu0 %v1257_v52  ;;  %v139_v52 = vperm.slane %v1660_v13, 3 }
  0x6b   :  { %874 = vmatpush.bf16.msra.mxu1 %v1321_v56 }
  0x6c   :  { %888 = vmatpush.bf16.msra.mxu2 %v1261_v57 }
  0x6d   :  { %902 = vmatpush.bf16.msra.mxu3 %v1325_v60 }
  0x6e   :  { %861 = vmatpush.bf16.msra.mxu0 %v1249_v0 }
  0x6f   :  { %875 = vmatpush.bf16.msra.mxu1 %v1313_v4 }
  0x70   :  { %889 = vmatpush.bf16.msra.mxu2 %v1253_v5 }
  0x71   :  { %903 = vmatpush.bf16.msra.mxu3 %v1317_v9 }
  0x72   :  { %862 = vmatpush.bf16.msra.mxu0 %v1241_v14  ;;  %v410_v14 = vld [vmem:[#allocation9] ss:$2 sm:$0x3] }
  0x73   :  { %876 = vmatpush.bf16.msra.mxu1 %v1305_v15  ;;  %v412_v15 = vperm.slane %v410_v14, 0 }
  0x74   :  { %890 = vmatpush.bf16.msra.mxu2 %v1245_v19  ;;  %v413_v19 = vperm.slane %v410_v14, 1  ;;  %v949_v14 = vlaneseq }
  0x75   :  { %904 = vmatpush.bf16.msra.mxu3 %v1309_v23 }
  0x76   :  { %863 = vmatpush.bf16.msra.mxu0 %v1233_v30 }
  0x77   :  { %877 = vmatpush.bf16.msra.mxu1 %v1297_v31  ;;  %v919_v31 = vperm.slane %v916_v21, 1 }
  0x78   :  { %891 = vmatpush.bf16.msra.mxu2 %v1237_v35 }
  0x79   :  { %905 = vmatpush.bf16.msra.mxu3 %v1301_v37 }
  0xb6   :  { %v319_v33 = vpop.f32.mrf.mxu0 }
  0xb7   :  { %v333_v36 = vpop.f32.mrf.mxu1  ;;  %v320_v38 = vadd.f32 %v319_v33, %v136_v32 }
  0xb8   :  { %v334_v39 = vadd.f32 %v333_v36, %v137_v34 }
  0xb9   :  { %v366_v41 = vmax.f32 %v320_v38, 0.0 }
  0xba   :  { %v367_v42 = vmax.f32 %v334_v39, 0.0 }
  0xbc   :  { %v374_v49 = vpack.c.bf16 %v367_v42, %v366_v41 }
  0xbe   :  { %v347_v40 = vpop.f32.mrf.mxu2  ;;  %v321_v43 = vpop.f32.mrf.mxu0  ;;  %v418_v55 = vunpack.c.l.b16 %v374_v49  ;;  %v419_v56 = vunpack.c.h.b16 %v374_v49 }
  0xbf   :  { %v361_v44 = vpop.f32.mrf.mxu3  ;;  %v322_v45 = vadd.f32 %v321_v43, %v136_v32  ;;  %v335_v46 = vpop.f32.mrf.mxu1  ;;  %v348_v60 = vadd.f32 %v347_v40, %v138_v51  ;;  %v680_v32 = vld [vmem:[#allocation9 + $0x1] ss:$2 sm:$0x3] }
  0xc0   :  { %v336_v47 = vadd.f32 %v335_v46, %v137_v34  ;;  %v362_v61 = vadd.f32 %v361_v44, %v139_v52  ;;  %v682_v35 = vperm.slane %v680_v32, 0 }
  0xc1   :  { %v370_v48 = vmax.f32 %v322_v45, 0.0  ;;  %v368_v2 = vmax.f32 %v348_v60, 0.0 }
  0xc2   :  { %v371_v50 = vmax.f32 %v336_v47, 0.0  ;;  %v369_v3 = vmax.f32 %v362_v61, 0.0 }
  0xc4   :  { %v376_v53 = vpack.c.bf16 %v371_v50, %v370_v48  ;;  %v375_v6 = vpack.c.bf16 %v369_v3, %v368_v2  ;;  %v683_v48 = vperm.slane %v680_v32, 1 }
  0xc6   :  { %v349_v54 = vpop.f32.mrf.mxu2  ;;  %v420_v57 = vunpack.c.l.b16 %v376_v53  ;;  %v421_v58 = vunpack.c.h.b16 %v376_v53  ;;  %v688_v8 = vunpack.c.l.b16 %v375_v6  ;;  %v689_v9 = vunpack.c.h.b16 %v375_v6 }
  0xc7   :  { %v363_v59 = vpop.f32.mrf.mxu3  ;;  %v350_v62 = vadd.f32 %v349_v54, %v138_v51 }
  0xc8   :  { %v364_v63 = vadd.f32 %v363_v59, %v139_v52  ;;  %v422_v0 = vpack.c.b16 %v420_v57, %v418_v55  ;;  %v423_v1 = vpack.c.b16 %v421_v58, %v419_v56  ;;  %v1358_v52 = vld [vmem:[%s1686_s5 + $0x1] ss:$2 sm:$0x3] }
  0xc9   :  { %v372_v4 = vmax.f32 %v350_v62, 0.0  ;;  %v935_v58 = vperm.slane %v1358_v52, 0  ;;  %v936_v62 = vperm.slane %v1358_v52, 1 }
  0xca   :  { %594 = vmatmul.bf16.vlgmr.msrb.gmra.mxu0 %v422_v0  ;;  %608 = vmatmul.bf16.vlgmr.msrb.gmra.mxu1 %v423_v1  ;;  %v373_v5 = vmax.f32 %v364_v63, 0.0 }
  0xcb   :  { %622 = vmatmul.bf16.vlgmr.msrb.gmra.mxu2 %v422_v0  ;;  %636 = vmatmul.bf16.vlgmr.msrb.gmra.mxu3 %v423_v1 }
  0xcc   :  { %v377_v7 = vpack.c.bf16 %v373_v5, %v372_v4 }
  0xce   :  { %v690_v10 = vunpack.c.l.b16 %v377_v7  ;;  %v691_v11 = vunpack.c.h.b16 %v377_v7 }
  0xd0   :  { %v692_v12 = vpack.c.b16 %v690_v10, %v688_v8  ;;  %v693_v13 = vpack.c.b16 %v691_v11, %v689_v9 }
  0xda   :  { %864 = vmatmul.bf16.vlgmr.msra.gmra.mxu0 %v692_v12  ;;  %878 = vmatmul.bf16.vlgmr.msra.gmra.mxu1 %v693_v13 }
  0xdb   :  { %892 = vmatmul.bf16.vlgmr.msra.gmra.mxu2 %v692_v12  ;;  %906 = vmatmul.bf16.vlgmr.msra.gmra.mxu3 %v693_v13 }
 0x147   :  { %v595_v16 = vpop.f32.mrf.mxu0  ;;  %v609_v17 = vpop.f32.mrf.mxu1 }
 0x148   :  { %v596_v18 = vadd.f32 %v595_v16, %v412_v15 }
 0x14a   :  { %v610_v20 = vadd.f32 %v609_v17, %v596_v18  ;;  %v1467_v17 = vld [vmem:[%s1687_s6] ss:$0 sm:$0xff] }
 0x14c   :  { %v642_v28 = vmax.f32 %v610_v20, 0.0 }
 0x14e   :  { %v623_v22 = vpop.f32.mrf.mxu2  ;;  %v637_v23 = vpop.f32.mrf.mxu3  ;;  %v922_v36 = vmul.f32 %v918_v27, %v642_v28 }
 0x14f   :  { %v624_v24 = vadd.f32 %v623_v22, %v413_v19  ;;  %v597_v25 = vpop.f32.mrf.mxu0  ;;  %v611_v26 = vpop.f32.mrf.mxu1 }
 0x150   :  { %v598_v30 = vadd.f32 %v597_v25, %v412_v15  ;;  %v950_v15 = vand.u32 127, %v949_v14 }
 0x151   :  { %v638_v29 = vadd.f32 %v637_v23, %v624_v24 }
 0x152   :  { %v612_v34 = vadd.f32 %v611_v26, %v598_v30  ;;  %vm951_vm0 = vcmp.eq.s32.totalorder %v950_v15, 0 }
 0x153   :  { %v643_v33 = vmax.f32 %v638_v29, 0.0 }
 0x154   :  { %v644_v43 = vmax.f32 %v612_v34, 0.0 }
 0x155   :  { %v923_v37 = vmul.f32 %v919_v31, %v643_v33 }
 0x156   :  { %v625_v38 = vpop.f32.mrf.mxu2  ;;  %v639_v39 = vpop.f32.mrf.mxu3  ;;  %v924_v49 = vmul.f32 %v918_v27, %v644_v43 }
 0x157   :  { %v626_v40 = vadd.f32 %v625_v38, %v413_v19  ;;  %v865_v41 = vpop.f32.mrf.mxu0  ;;  %v926_v42 = vadd.f32 %v923_v37, %v922_v36  ;;  %v879_v46 = vpop.f32.mrf.mxu1 }
 0x158   :  { %v866_v45 = vadd.f32 %v865_v41, %v682_v35 }
 0x159   :  { %v640_v44 = vadd.f32 %v639_v39, %v626_v40  ;;  %927 = vadd.xlane.f32.xlu0 %v926_v42 }
 0x15a   :  { %v880_v51 = vadd.f32 %v879_v46, %v866_v45 }
 0x15b   :  { %v645_v47 = vmax.f32 %v640_v44, 0.0 }
 0x15c   :  { %v912_v59 = vmax.f32 %v880_v51, 0.0 }
 0x15d   :  { %v925_v50 = vmul.f32 %v919_v31, %v645_v47 }
 0x15e   :  { %v893_v53 = vpop.f32.mrf.mxu2  ;;  %v907_v54 = vpop.f32.mrf.mxu3  ;;  %v939_v2 = vmul.f32 %v935_v58, %v912_v59 }
 0x15f   :  { %v894_v55 = vadd.f32 %v893_v53, %v683_v48  ;;  %v867_v56 = vpop.f32.mrf.mxu0  ;;  %v929_v57 = vadd.f32 %v925_v50, %v924_v49  ;;  %v881_v0 = vpop.f32.mrf.mxu1 }
 0x160   :  { %v868_v61 = vadd.f32 %v867_v56, %v682_v35 }
 0x161   :  { %v908_v60 = vadd.f32 %v907_v54, %v894_v55  ;;  %930 = vadd.xlane.f32.xlu0 %v929_v57 }
 0x162   :  { %v882_v1 = vadd.f32 %v881_v0, %v868_v61 }
 0x163   :  { %v913_v63 = vmax.f32 %v908_v60, 0.0 }
 0x164   :  { %v914_v8 = vmax.f32 %v882_v1, 0.0 }
 0x165   :  { %v940_v3 = vmul.f32 %v936_v62, %v913_v63 }
 0x166   :  { %v895_v4 = vpop.f32.mrf.mxu2  ;;  %v909_v7 = vpop.f32.mrf.mxu3  ;;  %v941_v11 = vmul.f32 %v935_v58, %v914_v8 }
 0x167   :  { %v896_v5 = vadd.f32 %v895_v4, %v683_v48  ;;  %v943_v6 = vadd.f32 %v940_v3, %v939_v2 }
 0x169   :  { %v910_v9 = vadd.f32 %v909_v7, %v896_v5  ;;  %944 = vadd.xlane.f32.xlu1 %v943_v6 }
 0x16b   :  { %v915_v10 = vmax.f32 %v910_v9, 0.0 }
 0x16d   :  { %v942_v12 = vmul.f32 %v936_v62, %v915_v10 }
 0x16f   :  { %v946_v13 = vadd.f32 %v942_v12, %v941_v11 }
 0x171   :  { %947 = vadd.xlane.f32.xlu1 %v946_v13 }
 0x1cc   :  { %v928_v16 = vpop.xlane.xlu0 %927 }
 0x1d4   :  { %v931_v21 = vpop.xlane.xlu0 %930 }
 0x1dc   :  { %v945_v18 = vpop.xlane.xlu1 %944 }
 0x1dd   :  { %v952_v19 = vsel %vm951_vm0, %v928_v16, %v945_v18 }
 0x1de   :  { %v958_v20 = vadd.f32 %v1467_v17, %v952_v19 }
 0x1e0   :  { %961 = vst.msk [vmem:[%s1688_s7] sm:$0xff] %vm960_vm1, %v958_v20 }
 0x1e4   :  { %v948_v22 = vpop.xlane.xlu1 %947 }
 0x1e5   :  { %v953_v23 = vsel %vm951_vm0, %v931_v21, %v948_v22 }
 0x1e6   :  { %v959_v24 = vadd.f32 %v1467_v17, %v953_v23 }
 0x1e8   :  { %962 = vst.msk [vmem:[%s1688_s7 + $0x8] sm:$0xff] %vm960_vm1, %v959_v24 }
 0x1e9   :  { %967 = vsyncpa [#allocation3], 1 }
 0x1ea   :  { %968 = vsyncpa [#allocation5], 1 }
 0x1eb   :  { %969 = vsyncpa [#allocation8], 1 }

</bundles_post_ra>
